<compile_context>
chip_gen: v6e
topology: v6e:2x2x1
jax: 0.10.0
libtpu: 0.0.40
codegen_flags: <defaults>
</compile_context>

<pallas_src>
import jax
import jax.numpy as jnp
from jax.experimental import pallas as pl
from jax.experimental.pallas import tpu as pltpu


def lstm_forward_kernel(gb_ref,   # (T+1, B, 8H) per-iteration additive gate terms, gate-major
                        w_ref,    # (2H+1, 8H)   rows 0:2H = W_big; row 2H = [0,out_w,out_b,0..]
                        o_ref):   # (B, 1)
    T1, B, H8 = gb_ref.shape
    T = T1 - 1
    H2 = H8 // 4                              # 2*hidden = one gate block (both layers)
    f32 = jnp.float32

    w_big = w_ref[0:H2, :]                    # (2H, 8H) block-fused recurrent weight
    out_vec = w_ref[H2:H2 + 1, 0:H2]          # (1, 2H): [0.., out_w]
    out_b = w_ref[H2:H2 + 1, H2:H2 + 1]       # (1, 1)

    def cell(gates, ccat):
        # One EUP sigmoid pass over the whole (B, 8H) two-layer gate block.
        # g-gate columns were pre-scaled by 2, so tanh(z) = 2*sigmoid(2z) - 1.
        s = jax.nn.sigmoid(gates)
        i = s[:, 0 * H2:1 * H2]
        f = s[:, 1 * H2:2 * H2]
        g = 2.0 * s[:, 2 * H2:3 * H2] - 1.0
        o = s[:, 3 * H2:4 * H2]
        c_new = f * ccat + i * g              # [c0_{t+1} | c1_t]
        h_new = o * jnp.tanh(c_new)           # [h0_{t+1} | h1_t]
        return h_new, c_new

    # Iteration 0: h/c are zero, so the recurrent matmul contributes nothing;
    # gates come straight from the precomputed slab (its layer-1 half is
    # engineered to yield exact zeros).  No MXU op here.
    hcat, ccat = cell(gb_ref[0], jnp.zeros((B, H2), f32))

    # Iterations 1..T, fully unrolled (T static & small): one fused matmul per
    # step covers layer-0 of step t and layer-1 of step t-1 together.
    for t in range(1, T + 1):
        gates = jnp.dot(hcat, w_big, preferred_element_type=f32) + gb_ref[t]
        hcat, ccat = cell(gates, ccat)

    # hcat = [h0_T (dead) | h1_{T-1}]; out_vec is zero over the first H lanes,
    # so the masked reduce is exactly out_layer(h1_{T-1}).
    o_ref[...] = jnp.sum(hcat * out_vec, axis=1, keepdims=True) + out_b


def lstm_forward(x, params):
    """x: (B, T) float32 -> (B,) float32 (matches the PyTorch LSTM.forward)."""
    B, T = x.shape
    (emb_w, emb_b, wih0, whh0, bih0, bhh0,
     wih1, whh1, bih1, bhh1, out_w, out_b) = params
    H = emb_w.shape[0]
    H2, H4, H8 = 2 * H, 4 * H, 8 * H
    f32 = jnp.float32

    # ------- one-time weight algebra in the wrapper (not the recurrent path) -------
    def interleave(a0, a1):
        # (.., 4H)[i,f,g,o] x2 -> (.., 8H) gate-major [i0 i1 | f0 f1 | g0 g1 | o0 o1],
        # matching the fused state layout [h0 | h1] / [c0 | c1].
        a0 = a0.reshape(a0.shape[:-1] + (4, H))
        a1 = a1.reshape(a1.shape[:-1] + (4, H))
        return jnp.concatenate([a0, a1], axis=-1).reshape(a0.shape[:-2] + (H8,))

    def scale_g(m):
        # Pre-scale the g-gate block by 2 (tanh(z) = 2*sigmoid(2z) - 1).
        return m.at[..., 2 * H2:3 * H2].multiply(2.0)

    # Fold emb_layer into the layer-0 input projection (valid because input_dim == 1):
    #   emb(x_t) @ wih0^T = x_t * (emb_w^T @ wih0^T) + emb_b @ wih0^T
    wih0_t = wih0.T.astype(f32)                                      # (H, 4H)
    w0x = emb_w.T.astype(f32) @ wih0_t                               # (1, 4H)
    b0x = (emb_b.reshape(1, H).astype(f32) @ wih0_t
           + (bih0 + bhh0).reshape(1, H4).astype(f32))               # (1, 4H)
    b1 = (bih1 + bhh1).reshape(1, H4).astype(f32)                    # (1, 4H)

    # Hoisted layer-0 input contribution for all timesteps (one broadcast mul).
    xg = x.T.astype(f32)[:, :, None] * w0x[None] + b0x[None]         # (T, B, 4H)

    # Block-fused recurrent weight:
    #   rows 0:H  (h0): layer-0 gates <- whh0^T, layer-1 gates <- wih1^T
    #   rows H:2H (h1): layer-0 gates <- 0,      layer-1 gates <- whh1^T
    w_top = interleave(whh0.T.astype(f32), wih1.T.astype(f32))       # (H, 8H)
    w_bot = interleave(jnp.zeros((H, H4), f32), whh1.T.astype(f32))  # (H, 8H)
    w_big = scale_g(jnp.concatenate([w_top, w_bot], axis=0))         # (2H, 8H)

    # Per-iteration additive gate slab (T+1 fused iterations):
    #   iteration k: layer-0 step k (xg[k]; zeros for the dead step k == T) and
    #   layer-1 step k-1 (b1; at k == 0 the i-gate is -1e30 so sigmoid -> 0 and
    #   h1/c1 come out exactly zero, i.e. the initial state).
    l0 = jnp.concatenate([xg, jnp.zeros((1, B, H4), f32)], axis=0)   # (T+1, B, 4H)
    b1_first = b1.at[:, 0:H].set(-1e30)                              # kill layer-1 i-gate at k=0
    l1 = jnp.broadcast_to(b1, (T + 1, B, H4))
    l1 = l1.at[0].set(jnp.broadcast_to(b1_first, (B, H4)))
    gb = scale_g(interleave(l0, l1))                                 # (T+1, B, 8H)

    # Out-layer packed into the last row of the weight slab: [0.., out_w, out_b, 0..].
    out_row = jnp.zeros((1, H8), f32)
    out_row = out_row.at[:, H:H2].set(out_w.reshape(1, H).astype(f32))
    out_row = out_row.at[:, H2:H2 + 1].set(out_b.reshape(1, 1).astype(f32))
    w_slab = jnp.concatenate([w_big, out_row], axis=0)               # (2H+1, 8H)

    vmem = pl.BlockSpec(memory_space=pltpu.MemorySpace.VMEM)
    out = pl.pallas_call(
        lstm_forward_kernel,
        out_shape=jax.ShapeDtypeStruct((B, 1), f32),
        in_specs=[vmem, vmem],
        out_specs=vmem,
    )(gb, w_slab)
    return out[:, 0]


def reference_forward(x, params):
    """Pure-JAX reference matching the PyTorch module semantics."""
    (emb_w, emb_b, wih0, whh0, bih0, bhh0,
     wih1, whh1, bih1, bhh1, out_w, out_b) = params
    B, T = x.shape
    H = emb_w.shape[0]
    xe = x[:, :, None] @ emb_w.T[None] + emb_b                       # (B, T, H)

    def run_layer(seq, wih, whh, bih, bhh):
        h = jnp.zeros((B, H), jnp.float32)
        c = jnp.zeros((B, H), jnp.float32)
        outs = []
        for t in range(T):
            g = seq[:, t] @ wih.T + bih + h @ whh.T + bhh
            i, f, gg, o = (jax.nn.sigmoid(g[:, :H]), jax.nn.sigmoid(g[:, H:2 * H]),
                           jnp.tanh(g[:, 2 * H:3 * H]), jax.nn.sigmoid(g[:, 3 * H:]))
            c = f * c + i * gg
            h = o * jnp.tanh(c)
            outs.append(h)
        return jnp.stack(outs, axis=1)

    y0 = run_layer(xe, wih0, whh0, bih0, bhh0)
    y1 = run_layer(y0, wih1, whh1, bih1, bhh1)
    return (y1[:, -1] @ out_w.T + out_b)[:, 0]


def init_params(key, input_dim=1, hidden_size=8):
    H = hidden_size
    ks = jax.random.split(key, 12)
    u = lambda k, shape, bound: jax.random.uniform(
        k, shape, jnp.float32, minval=-bound, maxval=bound)
    b_emb = 1.0 / jnp.sqrt(input_dim)
    b_h = 1.0 / jnp.sqrt(H)
    return (
        u(ks[0], (H, input_dim), b_emb),  # emb_layer.weight
        u(ks[1], (H,), b_emb),            # emb_layer.bias
        u(ks[2], (4 * H, H), b_h),        # lstm.weight_ih_l0
        u(ks[3], (4 * H, H), b_h),        # lstm.weight_hh_l0
        u(ks[4], (4 * H,), b_h),          # lstm.bias_ih_l0
        u(ks[5], (4 * H,), b_h),          # lstm.bias_hh_l0
        u(ks[6], (4 * H, H), b_h),        # lstm.weight_ih_l1
        u(ks[7], (4 * H, H), b_h),        # lstm.weight_hh_l1
        u(ks[8], (4 * H,), b_h),          # lstm.bias_ih_l1
        u(ks[9], (4 * H,), b_h),          # lstm.bias_hh_l1
        u(ks[10], (input_dim, H), b_h),   # out_layer.weight
        u(ks[11], (input_dim,), b_h),     # out_layer.bias
    )


if __name__ == "__main__":
    key = jax.random.PRNGKey(0)
    k_p, k_x = jax.random.split(key)
    B, T = 2, 8
    params = init_params(k_p, input_dim=1, hidden_size=8)
    x = jax.random.normal(k_x, (B, T), jnp.float32)

    out = lstm_forward(x, params)
    out = jax.block_until_ready(out)

    ref = reference_forward(x, params)
    assert out.shape == (B,)
    # tanh-via-sigmoid rewrite + folded embedding projection change rounding
    # order by a few ULP -> slightly loosened tolerance vs bit-exact.
    assert jnp.allclose(out, ref, atol=1e-4, rtol=1e-4), (out, ref)
    print("KERNEL_OK")
</pallas_src>

<mosaic_0001>
module attributes {stable_mosaic.version = 11 : i64} {
  func.func @lstm_forward_kernel(%arg0: memref<9x2x64xf32, #tpu.memory_space<vmem>>, %arg1: memref<17x64xf32, #tpu.memory_space<vmem>>, %arg2: memref<2x1xf32, #tpu.memory_space<vmem>>) attributes {dimension_semantics = [], scalar_prefetch = 0 : i64, scratch_operands = 0 : i64, tpu.core_type = #tpu.core_type<tc>} {
    %c0 = arith.constant 0 : index
    %c0_0 = arith.constant 0 : index
    %0 = vector.load %arg1[%c0, %c0_0] : memref<17x64xf32, #tpu.memory_space<vmem>>, vector<16x64xf32>
    %c16 = arith.constant 16 : index
    %c0_1 = arith.constant 0 : index
    %1 = vector.load %arg1[%c16, %c0_1] : memref<17x64xf32, #tpu.memory_space<vmem>>, vector<1x16xf32>
    %c16_2 = arith.constant 16 : index
    %c16_3 = arith.constant 16 : index
    %2 = vector.load %arg1[%c16_2, %c16_3] : memref<17x64xf32, #tpu.memory_space<vmem>>, vector<1x1xf32>
    %c0_4 = arith.constant 0 : index
    %c0_5 = arith.constant 0 : index
    %c0_6 = arith.constant 0 : index
    %3 = vector.load %arg0[%c0_4, %c0_5, %c0_6] : memref<9x2x64xf32, #tpu.memory_space<vmem>>, vector<1x2x64xf32>
    %4 = vector.shape_cast %3 : vector<1x2x64xf32> to vector<2x64xf32>
    %cst = arith.constant 0.000000e+00 : f32
    %5 = vector.broadcast %cst : f32 to vector<2x16xf32>
    %6 = arith.negf %4 : vector<2x64xf32>
    %7 = math.exp %6 : vector<2x64xf32>
    %cst_7 = arith.constant 1.000000e+00 : f32
    %8 = vector.broadcast %cst_7 : f32 to vector<2x64xf32>
    %9 = arith.addf %8, %7 : vector<2x64xf32>
    %10 = arith.divf %8, %9 : vector<2x64xf32>
    %11 = vector.extract_strided_slice %10 {offsets = [0, 0], sizes = [2, 16], strides = [1, 1]} : vector<2x64xf32> to vector<2x16xf32>
    %12 = vector.extract_strided_slice %10 {offsets = [0, 16], sizes = [2, 16], strides = [1, 1]} : vector<2x64xf32> to vector<2x16xf32>
    %13 = vector.extract_strided_slice %10 {offsets = [0, 32], sizes = [2, 16], strides = [1, 1]} : vector<2x64xf32> to vector<2x16xf32>
    %cst_8 = arith.constant 2.000000e+00 : f32
    %14 = vector.broadcast %cst_8 : f32 to vector<2x16xf32>
    %15 = arith.mulf %14, %13 : vector<2x16xf32>
    %cst_9 = arith.constant 1.000000e+00 : f32
    %16 = vector.broadcast %cst_9 : f32 to vector<2x16xf32>
    %17 = arith.subf %15, %16 : vector<2x16xf32>
    %18 = vector.extract_strided_slice %10 {offsets = [0, 48], sizes = [2, 16], strides = [1, 1]} : vector<2x64xf32> to vector<2x16xf32>
    %19 = arith.mulf %12, %5 : vector<2x16xf32>
    %20 = arith.mulf %11, %17 : vector<2x16xf32>
    %21 = arith.addf %19, %20 : vector<2x16xf32>
    %22 = math.tanh %21 : vector<2x16xf32>
    %23 = arith.mulf %18, %22 : vector<2x16xf32>
    %cst_10 = arith.constant dense<0.000000e+00> : vector<2x64xf32>
    %24 = tpu.matmul %23, %0, %cst_10 {dimension_numbers = #tpu.dot_dimension_numbers<[1], [0], [0], [1], [0, 0, 1, 1], [], []>} : vector<2x16xf32>, vector<16x64xf32>, vector<2x64xf32> -> vector<2x64xf32>
    %c1 = arith.constant 1 : index
    %c0_11 = arith.constant 0 : index
    %c0_12 = arith.constant 0 : index
    %25 = vector.load %arg0[%c1, %c0_11, %c0_12] : memref<9x2x64xf32, #tpu.memory_space<vmem>>, vector<1x2x64xf32>
    %26 = vector.shape_cast %25 : vector<1x2x64xf32> to vector<2x64xf32>
    %27 = arith.addf %24, %26 : vector<2x64xf32>
    %28 = arith.negf %27 : vector<2x64xf32>
    %29 = math.exp %28 : vector<2x64xf32>
    %cst_13 = arith.constant 1.000000e+00 : f32
    %30 = vector.broadcast %cst_13 : f32 to vector<2x64xf32>
    %31 = arith.addf %30, %29 : vector<2x64xf32>
    %32 = arith.divf %30, %31 : vector<2x64xf32>
    %33 = vector.extract_strided_slice %32 {offsets = [0, 0], sizes = [2, 16], strides = [1, 1]} : vector<2x64xf32> to vector<2x16xf32>
    %34 = vector.extract_strided_slice %32 {offsets = [0, 16], sizes = [2, 16], strides = [1, 1]} : vector<2x64xf32> to vector<2x16xf32>
    %35 = vector.extract_strided_slice %32 {offsets = [0, 32], sizes = [2, 16], strides = [1, 1]} : vector<2x64xf32> to vector<2x16xf32>
    %cst_14 = arith.constant 2.000000e+00 : f32
    %36 = vector.broadcast %cst_14 : f32 to vector<2x16xf32>
    %37 = arith.mulf %36, %35 : vector<2x16xf32>
    %cst_15 = arith.constant 1.000000e+00 : f32
    %38 = vector.broadcast %cst_15 : f32 to vector<2x16xf32>
    %39 = arith.subf %37, %38 : vector<2x16xf32>
    %40 = vector.extract_strided_slice %32 {offsets = [0, 48], sizes = [2, 16], strides = [1, 1]} : vector<2x64xf32> to vector<2x16xf32>
    %41 = arith.mulf %34, %21 : vector<2x16xf32>
    %42 = arith.mulf %33, %39 : vector<2x16xf32>
    %43 = arith.addf %41, %42 : vector<2x16xf32>
    %44 = math.tanh %43 : vector<2x16xf32>
    %45 = arith.mulf %40, %44 : vector<2x16xf32>
    %cst_16 = arith.constant dense<0.000000e+00> : vector<2x64xf32>
    %46 = tpu.matmul %45, %0, %cst_16 {dimension_numbers = #tpu.dot_dimension_numbers<[1], [0], [0], [1], [0, 0, 1, 1], [], []>} : vector<2x16xf32>, vector<16x64xf32>, vector<2x64xf32> -> vector<2x64xf32>
    %c2 = arith.constant 2 : index
    %c0_17 = arith.constant 0 : index
    %c0_18 = arith.constant 0 : index
    %47 = vector.load %arg0[%c2, %c0_17, %c0_18] : memref<9x2x64xf32, #tpu.memory_space<vmem>>, vector<1x2x64xf32>
    %48 = vector.shape_cast %47 : vector<1x2x64xf32> to vector<2x64xf32>
    %49 = arith.addf %46, %48 : vector<2x64xf32>
    %50 = arith.negf %49 : vector<2x64xf32>
    %51 = math.exp %50 : vector<2x64xf32>
    %cst_19 = arith.constant 1.000000e+00 : f32
    %52 = vector.broadcast %cst_19 : f32 to vector<2x64xf32>
    %53 = arith.addf %52, %51 : vector<2x64xf32>
    %54 = arith.divf %52, %53 : vector<2x64xf32>
    %55 = vector.extract_strided_slice %54 {offsets = [0, 0], sizes = [2, 16], strides = [1, 1]} : vector<2x64xf32> to vector<2x16xf32>
    %56 = vector.extract_strided_slice %54 {offsets = [0, 16], sizes = [2, 16], strides = [1, 1]} : vector<2x64xf32> to vector<2x16xf32>
    %57 = vector.extract_strided_slice %54 {offsets = [0, 32], sizes = [2, 16], strides = [1, 1]} : vector<2x64xf32> to vector<2x16xf32>
    %cst_20 = arith.constant 2.000000e+00 : f32
    %58 = vector.broadcast %cst_20 : f32 to vector<2x16xf32>
    %59 = arith.mulf %58, %57 : vector<2x16xf32>
    %cst_21 = arith.constant 1.000000e+00 : f32
    %60 = vector.broadcast %cst_21 : f32 to vector<2x16xf32>
    %61 = arith.subf %59, %60 : vector<2x16xf32>
    %62 = vector.extract_strided_slice %54 {offsets = [0, 48], sizes = [2, 16], strides = [1, 1]} : vector<2x64xf32> to vector<2x16xf32>
    %63 = arith.mulf %56, %43 : vector<2x16xf32>
    %64 = arith.mulf %55, %61 : vector<2x16xf32>
    %65 = arith.addf %63, %64 : vector<2x16xf32>
    %66 = math.tanh %65 : vector<2x16xf32>
    %67 = arith.mulf %62, %66 : vector<2x16xf32>
    %cst_22 = arith.constant dense<0.000000e+00> : vector<2x64xf32>
    %68 = tpu.matmul %67, %0, %cst_22 {dimension_numbers = #tpu.dot_dimension_numbers<[1], [0], [0], [1], [0, 0, 1, 1], [], []>} : vector<2x16xf32>, vector<16x64xf32>, vector<2x64xf32> -> vector<2x64xf32>
    %c3 = arith.constant 3 : index
    %c0_23 = arith.constant 0 : index
    %c0_24 = arith.constant 0 : index
    %69 = vector.load %arg0[%c3, %c0_23, %c0_24] : memref<9x2x64xf32, #tpu.memory_space<vmem>>, vector<1x2x64xf32>
    %70 = vector.shape_cast %69 : vector<1x2x64xf32> to vector<2x64xf32>
    %71 = arith.addf %68, %70 : vector<2x64xf32>
    %72 = arith.negf %71 : vector<2x64xf32>
    %73 = math.exp %72 : vector<2x64xf32>
    %cst_25 = arith.constant 1.000000e+00 : f32
    %74 = vector.broadcast %cst_25 : f32 to vector<2x64xf32>
    %75 = arith.addf %74, %73 : vector<2x64xf32>
    %76 = arith.divf %74, %75 : vector<2x64xf32>
    %77 = vector.extract_strided_slice %76 {offsets = [0, 0], sizes = [2, 16], strides = [1, 1]} : vector<2x64xf32> to vector<2x16xf32>
    %78 = vector.extract_strided_slice %76 {offsets = [0, 16], sizes = [2, 16], strides = [1, 1]} : vector<2x64xf32> to vector<2x16xf32>
    %79 = vector.extract_strided_slice %76 {offsets = [0, 32], sizes = [2, 16], strides = [1, 1]} : vector<2x64xf32> to vector<2x16xf32>
    %cst_26 = arith.constant 2.000000e+00 : f32
    %80 = vector.broadcast %cst_26 : f32 to vector<2x16xf32>
    %81 = arith.mulf %80, %79 : vector<2x16xf32>
    %cst_27 = arith.constant 1.000000e+00 : f32
    %82 = vector.broadcast %cst_27 : f32 to vector<2x16xf32>
    %83 = arith.subf %81, %82 : vector<2x16xf32>
    %84 = vector.extract_strided_slice %76 {offsets = [0, 48], sizes = [2, 16], strides = [1, 1]} : vector<2x64xf32> to vector<2x16xf32>
    %85 = arith.mulf %78, %65 : vector<2x16xf32>
    %86 = arith.mulf %77, %83 : vector<2x16xf32>
    %87 = arith.addf %85, %86 : vector<2x16xf32>
    %88 = math.tanh %87 : vector<2x16xf32>
    %89 = arith.mulf %84, %88 : vector<2x16xf32>
    %cst_28 = arith.constant dense<0.000000e+00> : vector<2x64xf32>
    %90 = tpu.matmul %89, %0, %cst_28 {dimension_numbers = #tpu.dot_dimension_numbers<[1], [0], [0], [1], [0, 0, 1, 1], [], []>} : vector<2x16xf32>, vector<16x64xf32>, vector<2x64xf32> -> vector<2x64xf32>
    %c4 = arith.constant 4 : index
    %c0_29 = arith.constant 0 : index
    %c0_30 = arith.constant 0 : index
    %91 = vector.load %arg0[%c4, %c0_29, %c0_30] : memref<9x2x64xf32, #tpu.memory_space<vmem>>, vector<1x2x64xf32>
    %92 = vector.shape_cast %91 : vector<1x2x64xf32> to vector<2x64xf32>
    %93 = arith.addf %90, %92 : vector<2x64xf32>
    %94 = arith.negf %93 : vector<2x64xf32>
    %95 = math.exp %94 : vector<2x64xf32>
    %cst_31 = arith.constant 1.000000e+00 : f32
    %96 = vector.broadcast %cst_31 : f32 to vector<2x64xf32>
    %97 = arith.addf %96, %95 : vector<2x64xf32>
    %98 = arith.divf %96, %97 : vector<2x64xf32>
    %99 = vector.extract_strided_slice %98 {offsets = [0, 0], sizes = [2, 16], strides = [1, 1]} : vector<2x64xf32> to vector<2x16xf32>
    %100 = vector.extract_strided_slice %98 {offsets = [0, 16], sizes = [2, 16], strides = [1, 1]} : vector<2x64xf32> to vector<2x16xf32>
    %101 = vector.extract_strided_slice %98 {offsets = [0, 32], sizes = [2, 16], strides = [1, 1]} : vector<2x64xf32> to vector<2x16xf32>
    %cst_32 = arith.constant 2.000000e+00 : f32
    %102 = vector.broadcast %cst_32 : f32 to vector<2x16xf32>
    %103 = arith.mulf %102, %101 : vector<2x16xf32>
    %cst_33 = arith.constant 1.000000e+00 : f32
    %104 = vector.broadcast %cst_33 : f32 to vector<2x16xf32>
    %105 = arith.subf %103, %104 : vector<2x16xf32>
    %106 = vector.extract_strided_slice %98 {offsets = [0, 48], sizes = [2, 16], strides = [1, 1]} : vector<2x64xf32> to vector<2x16xf32>
    %107 = arith.mulf %100, %87 : vector<2x16xf32>
    %108 = arith.mulf %99, %105 : vector<2x16xf32>
    %109 = arith.addf %107, %108 : vector<2x16xf32>
    %110 = math.tanh %109 : vector<2x16xf32>
    %111 = arith.mulf %106, %110 : vector<2x16xf32>
    %cst_34 = arith.constant dense<0.000000e+00> : vector<2x64xf32>
    %112 = tpu.matmul %111, %0, %cst_34 {dimension_numbers = #tpu.dot_dimension_numbers<[1], [0], [0], [1], [0, 0, 1, 1], [], []>} : vector<2x16xf32>, vector<16x64xf32>, vector<2x64xf32> -> vector<2x64xf32>
    %c5 = arith.constant 5 : index
    %c0_35 = arith.constant 0 : index
    %c0_36 = arith.constant 0 : index
    %113 = vector.load %arg0[%c5, %c0_35, %c0_36] : memref<9x2x64xf32, #tpu.memory_space<vmem>>, vector<1x2x64xf32>
    %114 = vector.shape_cast %113 : vector<1x2x64xf32> to vector<2x64xf32>
    %115 = arith.addf %112, %114 : vector<2x64xf32>
    %116 = arith.negf %115 : vector<2x64xf32>
    %117 = math.exp %116 : vector<2x64xf32>
    %cst_37 = arith.constant 1.000000e+00 : f32
    %118 = vector.broadcast %cst_37 : f32 to vector<2x64xf32>
    %119 = arith.addf %118, %117 : vector<2x64xf32>
    %120 = arith.divf %118, %119 : vector<2x64xf32>
    %121 = vector.extract_strided_slice %120 {offsets = [0, 0], sizes = [2, 16], strides = [1, 1]} : vector<2x64xf32> to vector<2x16xf32>
    %122 = vector.extract_strided_slice %120 {offsets = [0, 16], sizes = [2, 16], strides = [1, 1]} : vector<2x64xf32> to vector<2x16xf32>
    %123 = vector.extract_strided_slice %120 {offsets = [0, 32], sizes = [2, 16], strides = [1, 1]} : vector<2x64xf32> to vector<2x16xf32>
    %cst_38 = arith.constant 2.000000e+00 : f32
    %124 = vector.broadcast %cst_38 : f32 to vector<2x16xf32>
    %125 = arith.mulf %124, %123 : vector<2x16xf32>
    %cst_39 = arith.constant 1.000000e+00 : f32
    %126 = vector.broadcast %cst_39 : f32 to vector<2x16xf32>
    %127 = arith.subf %125, %126 : vector<2x16xf32>
    %128 = vector.extract_strided_slice %120 {offsets = [0, 48], sizes = [2, 16], strides = [1, 1]} : vector<2x64xf32> to vector<2x16xf32>
    %129 = arith.mulf %122, %109 : vector<2x16xf32>
    %130 = arith.mulf %121, %127 : vector<2x16xf32>
    %131 = arith.addf %129, %130 : vector<2x16xf32>
    %132 = math.tanh %131 : vector<2x16xf32>
    %133 = arith.mulf %128, %132 : vector<2x16xf32>
    %cst_40 = arith.constant dense<0.000000e+00> : vector<2x64xf32>
    %134 = tpu.matmul %133, %0, %cst_40 {dimension_numbers = #tpu.dot_dimension_numbers<[1], [0], [0], [1], [0, 0, 1, 1], [], []>} : vector<2x16xf32>, vector<16x64xf32>, vector<2x64xf32> -> vector<2x64xf32>
    %c6 = arith.constant 6 : index
    %c0_41 = arith.constant 0 : index
    %c0_42 = arith.constant 0 : index
    %135 = vector.load %arg0[%c6, %c0_41, %c0_42] : memref<9x2x64xf32, #tpu.memory_space<vmem>>, vector<1x2x64xf32>
    %136 = vector.shape_cast %135 : vector<1x2x64xf32> to vector<2x64xf32>
    %137 = arith.addf %134, %136 : vector<2x64xf32>
    %138 = arith.negf %137 : vector<2x64xf32>
    %139 = math.exp %138 : vector<2x64xf32>
    %cst_43 = arith.constant 1.000000e+00 : f32
    %140 = vector.broadcast %cst_43 : f32 to vector<2x64xf32>
    %141 = arith.addf %140, %139 : vector<2x64xf32>
    %142 = arith.divf %140, %141 : vector<2x64xf32>
    %143 = vector.extract_strided_slice %142 {offsets = [0, 0], sizes = [2, 16], strides = [1, 1]} : vector<2x64xf32> to vector<2x16xf32>
    %144 = vector.extract_strided_slice %142 {offsets = [0, 16], sizes = [2, 16], strides = [1, 1]} : vector<2x64xf32> to vector<2x16xf32>
    %145 = vector.extract_strided_slice %142 {offsets = [0, 32], sizes = [2, 16], strides = [1, 1]} : vector<2x64xf32> to vector<2x16xf32>
    %cst_44 = arith.constant 2.000000e+00 : f32
    %146 = vector.broadcast %cst_44 : f32 to vector<2x16xf32>
    %147 = arith.mulf %146, %145 : vector<2x16xf32>
    %cst_45 = arith.constant 1.000000e+00 : f32
    %148 = vector.broadcast %cst_45 : f32 to vector<2x16xf32>
    %149 = arith.subf %147, %148 : vector<2x16xf32>
    %150 = vector.extract_strided_slice %142 {offsets = [0, 48], sizes = [2, 16], strides = [1, 1]} : vector<2x64xf32> to vector<2x16xf32>
    %151 = arith.mulf %144, %131 : vector<2x16xf32>
    %152 = arith.mulf %143, %149 : vector<2x16xf32>
    %153 = arith.addf %151, %152 : vector<2x16xf32>
    %154 = math.tanh %153 : vector<2x16xf32>
    %155 = arith.mulf %150, %154 : vector<2x16xf32>
    %cst_46 = arith.constant dense<0.000000e+00> : vector<2x64xf32>
    %156 = tpu.matmul %155, %0, %cst_46 {dimension_numbers = #tpu.dot_dimension_numbers<[1], [0], [0], [1], [0, 0, 1, 1], [], []>} : vector<2x16xf32>, vector<16x64xf32>, vector<2x64xf32> -> vector<2x64xf32>
    %c7 = arith.constant 7 : index
    %c0_47 = arith.constant 0 : index
    %c0_48 = arith.constant 0 : index
    %157 = vector.load %arg0[%c7, %c0_47, %c0_48] : memref<9x2x64xf32, #tpu.memory_space<vmem>>, vector<1x2x64xf32>
    %158 = vector.shape_cast %157 : vector<1x2x64xf32> to vector<2x64xf32>
    %159 = arith.addf %156, %158 : vector<2x64xf32>
    %160 = arith.negf %159 : vector<2x64xf32>
    %161 = math.exp %160 : vector<2x64xf32>
    %cst_49 = arith.constant 1.000000e+00 : f32
    %162 = vector.broadcast %cst_49 : f32 to vector<2x64xf32>
    %163 = arith.addf %162, %161 : vector<2x64xf32>
    %164 = arith.divf %162, %163 : vector<2x64xf32>
    %165 = vector.extract_strided_slice %164 {offsets = [0, 0], sizes = [2, 16], strides = [1, 1]} : vector<2x64xf32> to vector<2x16xf32>
    %166 = vector.extract_strided_slice %164 {offsets = [0, 16], sizes = [2, 16], strides = [1, 1]} : vector<2x64xf32> to vector<2x16xf32>
    %167 = vector.extract_strided_slice %164 {offsets = [0, 32], sizes = [2, 16], strides = [1, 1]} : vector<2x64xf32> to vector<2x16xf32>
    %cst_50 = arith.constant 2.000000e+00 : f32
    %168 = vector.broadcast %cst_50 : f32 to vector<2x16xf32>
    %169 = arith.mulf %168, %167 : vector<2x16xf32>
    %cst_51 = arith.constant 1.000000e+00 : f32
    %170 = vector.broadcast %cst_51 : f32 to vector<2x16xf32>
    %171 = arith.subf %169, %170 : vector<2x16xf32>
    %172 = vector.extract_strided_slice %164 {offsets = [0, 48], sizes = [2, 16], strides = [1, 1]} : vector<2x64xf32> to vector<2x16xf32>
    %173 = arith.mulf %166, %153 : vector<2x16xf32>
    %174 = arith.mulf %165, %171 : vector<2x16xf32>
    %175 = arith.addf %173, %174 : vector<2x16xf32>
    %176 = math.tanh %175 : vector<2x16xf32>
    %177 = arith.mulf %172, %176 : vector<2x16xf32>
    %cst_52 = arith.constant dense<0.000000e+00> : vector<2x64xf32>
    %178 = tpu.matmul %177, %0, %cst_52 {dimension_numbers = #tpu.dot_dimension_numbers<[1], [0], [0], [1], [0, 0, 1, 1], [], []>} : vector<2x16xf32>, vector<16x64xf32>, vector<2x64xf32> -> vector<2x64xf32>
    %c8 = arith.constant 8 : index
    %c0_53 = arith.constant 0 : index
    %c0_54 = arith.constant 0 : index
    %179 = vector.load %arg0[%c8, %c0_53, %c0_54] : memref<9x2x64xf32, #tpu.memory_space<vmem>>, vector<1x2x64xf32>
    %180 = vector.shape_cast %179 : vector<1x2x64xf32> to vector<2x64xf32>
    %181 = arith.addf %178, %180 : vector<2x64xf32>
    %182 = arith.negf %181 : vector<2x64xf32>
    %183 = math.exp %182 : vector<2x64xf32>
    %cst_55 = arith.constant 1.000000e+00 : f32
    %184 = vector.broadcast %cst_55 : f32 to vector<2x64xf32>
    %185 = arith.addf %184, %183 : vector<2x64xf32>
    %186 = arith.divf %184, %185 : vector<2x64xf32>
    %187 = vector.extract_strided_slice %186 {offsets = [0, 0], sizes = [2, 16], strides = [1, 1]} : vector<2x64xf32> to vector<2x16xf32>
    %188 = vector.extract_strided_slice %186 {offsets = [0, 16], sizes = [2, 16], strides = [1, 1]} : vector<2x64xf32> to vector<2x16xf32>
    %189 = vector.extract_strided_slice %186 {offsets = [0, 32], sizes = [2, 16], strides = [1, 1]} : vector<2x64xf32> to vector<2x16xf32>
    %cst_56 = arith.constant 2.000000e+00 : f32
    %190 = vector.broadcast %cst_56 : f32 to vector<2x16xf32>
    %191 = arith.mulf %190, %189 : vector<2x16xf32>
    %cst_57 = arith.constant 1.000000e+00 : f32
    %192 = vector.broadcast %cst_57 : f32 to vector<2x16xf32>
    %193 = arith.subf %191, %192 : vector<2x16xf32>
    %194 = vector.extract_strided_slice %186 {offsets = [0, 48], sizes = [2, 16], strides = [1, 1]} : vector<2x64xf32> to vector<2x16xf32>
    %195 = arith.mulf %188, %175 : vector<2x16xf32>
    %196 = arith.mulf %187, %193 : vector<2x16xf32>
    %197 = arith.addf %195, %196 : vector<2x16xf32>
    %198 = math.tanh %197 : vector<2x16xf32>
    %199 = arith.mulf %194, %198 : vector<2x16xf32>
    %200 = vector.broadcast %1 : vector<1x16xf32> to vector<2x16xf32>
    %201 = arith.mulf %199, %200 : vector<2x16xf32>
    %cst_58 = arith.constant dense<0.000000e+00> : vector<2xf32>
    %202 = vector.multi_reduction <add>, %201, %cst_58 [1] : vector<2x16xf32> to vector<2xf32>
    %203 = vector.shape_cast %202 : vector<2xf32> to vector<2x1xf32>
    %204 = vector.broadcast %2 : vector<1x1xf32> to vector<2x1xf32>
    %205 = arith.addf %203, %204 : vector<2x1xf32>
    %c0_59 = arith.constant 0 : index
    %c0_60 = arith.constant 0 : index
    %206 = vector.load %arg2[%c0_59, %c0_60] : memref<2x1xf32, #tpu.memory_space<vmem>>, vector<2x1xf32>
    tpu.vector_store %arg2[%c0_59, %c0_60], %205 {strides = array<i32>} : memref<2x1xf32, #tpu.memory_space<vmem>>, vector<2x1xf32>,
    return
  }
}

</mosaic_0001>

<bundles_post_ra>
// kernel: tpu_custom_call.1
= control target key start
LH: loop header
LB: loop body
LE: loop exit
PB: predicated region body
PF: predicated region fallthrough
CT: control target
= control target key end

     0   :  { %7 = vsyncpa [#allocation3], 0  ;;  %s1268_s0 = inlined_call_operand.hbm [shape: f32[9,2,64], index: 0, kind: input, shape index: {}]   ;;  %s1269_s1 = inlined_call_operand.hbm [shape: f32[17,64], index: 1, kind: input, shape index: {}]   ;;  %s1270_s2 = inlined_call_operand.vmem [shape: f32[2,1], index: 2, kind: output, shape index: {}]  }
   0x1   :  { %8 = vsyncpa [#allocation5], 0  ;;  %s1133_s9 = smov [#allocation2]  }
   0x2   :  { %s14_s10 = sshll.u32 %s1133_s9, 4  ;;  %s15_s10 = int_to_ptr.vmem [resolvable:$true] %s14_s10 }
   0x3   :  { %s1097_s11 = scalar_lea.vmem %s15_s10, 288  ;;  %p1102_p1 = scmp.lt.s32.totalorder %s15_s10, %s15_s10 }
   0x4   :  { %p1098_p0 = scmp.ne.s32.totalorder %s15_s10, %s1097_s11  ;;  %p1103_p2 = scmp.lt.s32.totalorder %s1097_s11, %s1097_s11 }
   0x6   :  { %p1104_p3 = por %p1103_p2, %p1102_p1 }
   0x8   :  { %p1105_p4 = pnand %p1104_p3, %p1098_p0 }
   0xa   :  { %1108 = shalt.err (!%p1105_p4)
}
   0xb   :  { %s1134_s12 = smov 32   ;;  %s1135_s13 = smov 2  }
   0xc   :  { %20 = dma.hbm_to_vmem [thread:$0]  %s1268_s0, 288, %s15_s10, [#allocation3], %s1134_s12, %s1134_s12, %s1135_s13  }
   0xd   :  { %s1136_s16 = smov [#allocation4]  }
   0xe   :  { %s26_s17 = sshll.u32 %s1136_s16, 4  ;;  %s27_s17 = int_to_ptr.vmem [resolvable:$true] %s26_s17 }
   0xf   :  { %s1117_s18 = scalar_lea.vmem %s27_s17, 384  ;;  %p1122_p6 = scmp.lt.s32.totalorder %s27_s17, %s27_s17 }
  0x10   :  { %p1118_p5 = scmp.ne.s32.totalorder %s27_s17, %s1117_s18  ;;  %p1123_p7 = scmp.lt.s32.totalorder %s1117_s18, %s1117_s18 }
  0x12   :  { %p1124_p8 = por %p1123_p7, %p1122_p6 }
  0x14   :  { %p1125_p9 = pnand %p1124_p8, %p1118_p5 }
  0x16   :  { %1128 = shalt.err (!%p1125_p9)
}
  0x17   :  { %s1137_s19 = smov 128   ;;  %s1138_s20 = smov 8  }
  0x18   :  { %32 = dma.hbm_to_vmem [thread:$0]  %s1269_s1, 384, %s27_s17, [#allocation5], %s1137_s19, %s1137_s19, %s1138_s20  }
  0x19   :  { %1129 = dma.done.wait [#allocation3], 288  }
  0x1a   :  { %1130 = vsyncadd [#allocation3], 4294967008 }
  0x1b   :  { %1131 = dma.done.wait [#allocation5], 384  }
  0x1c   :  { %1132 = vsyncadd [#allocation5], 4294966912  ;;  %v42_v0 = vld [vmem:[#allocation2] sm:$0x3]  ;;  %s1139_s0 = smov 96   ;;  %s1140_s23 = smov 16  }
  0x1d   :  { %v915_v1 = vmul.f32 -1.442695, %v42_v0  ;;  %v1171_v12 = vld [vmem:[#allocation4 + $0x8] sm:$0xff]  ;;  %v1141_v13 = vmov 0.0   ;;  %vm1142_vm0 = vmmov 0   ;;  %v1184_v15 = vld [vmem:[#allocation4] sm:$0xff] }
  0x1e   :  { %966 = vmatprep.subr.mxu0 %v1141_v13  ;;  %970 = vmatprep.mubr.msk.f32.mxu0 %vm1142_vm0, %v1141_v13  ;;  %s1143_s1 = smov 80   ;;  %vm73_vm1 = vcmask 130048   ;;  %v69_v19 = vld [vmem:[#allocation2 + $0x2] sm:$0x3]  ;;  %v172_v38 = vld [vmem:[#allocation2 + $0x4] sm:$0x3] }
  0x1f   :  { %1035 = vpow2.f32 %v915_v1  ;;  %967 = vmatpush3.msra.mxu0 %v1171_v12  ;;  %973 = vmatprep.subr.mxu1 %v1141_v13  ;;  %v274_v57 = vld [vmem:[#allocation2 + $0x6] sm:$0x3]  ;;  %s1144_s24 = smov 48   ;;  %vm898_vm2 = vcmask 123904   ;;  %s1145_s25 = smov 112   ;;  %vm907_vm3 = vcmask 1024  }
  0x20   :  { %968 = vmatprep.subr.mxu0 %v1141_v13  ;;  %974 = vmatpush3.msra.mxu1 %v1171_v12 }
  0x21   :  { %975 = vmatprep.subr.mxu1 %v1141_v13  ;;  %977 = vmatprep.mubr.msk.f32.mxu1 %vm1142_vm0, %v1141_v13 }
  0x22   :  { %969 = vmatpush3.msra.mxu0 %v1184_v15  ;;  %976 = vmatpush3.msra.mxu1 %v1184_v15 }
  0x23   :  { %980 = vmatprep.subr.mxu0 %v1141_v13  ;;  %987 = vmatprep.subr.mxu1 %v1141_v13 }
  0x2c   :  { %v1036_v2 = vpop.eup %1035 }
  0x2d   :  { %v46_v3 = vadd.f32 1.0, %v1036_v2 }
  0x2f   :  { %1037 = vrcp.f32 %v46_v3 }
  0x3c   :  { %v1038_v4 = vpop.eup %1037 }
  0x3d   :  { %v49_v5 = vmul.f32 2.0, %v1038_v4  ;;  %v51_v9 = vmul.f32 0.0, %v1038_v4 }
  0x3f   :  { %v916_v6 = vadd.f32 -1.0, %v49_v5 }
  0x41   :  { %53 = vrot.lane.b32.xlu0 %v916_v6, %s1139_s0 }
  0xb3   :  { %v54_v7 = vpop.permute.xlu0 %53 }
  0xb4   :  { %v56_v8 = vmul.f32 %v1038_v4, %v54_v7 }
  0xb6   :  { %58 = vrot.lane.b32.xlu0 %v56_v8, %s1140_s23 }
 0x128   :  { %v59_v10 = vpop.permute.xlu0 %58 }
 0x129   :  { %v61_v11 = vadd.f32 %v59_v10, %v51_v9 }
 0x12b   :  { %1039 = vtanh.f32 %v61_v11 }
 0x138   :  { %v1040_v14 = vpop.eup %1039 }
 0x139   :  { %64 = vrot.lane.b32.xlu1 %v1040_v14, %s1134_s12  ;;  %v376_v14 = vld [vmem:[#allocation2 + $0x8] sm:$0x3] }
 0x1ab   :  { %v65_v16 = vpop.permute.xlu1 %64 }
 0x1ac   :  { %v67_v17 = vmul.f32 %v1038_v4, %v65_v16 }
 0x1ae   :  { %71 = vrot.lane.b32.xlu1 %v67_v17, %s1143_s1 }
 0x220   :  { %v72_v18 = vpop.permute.xlu1 %71 }
 0x221   :  { %971 = vmatmul.mubr.msk.f32.vlgmr.msra.gmra.mxu0 %vm73_vm1, %v72_v18 }
 0x222   :  { %981 = vmatpush3.msra.mxu0 %v1171_v12  ;;  %984 = vmatprep.mubr.msk.f32.mxu0 %vm1142_vm0, %v1141_v13 }
 0x223   :  { %982 = vmatprep.subr.mxu0 %v1141_v13 }
 0x224   :  { %983 = vmatpush3.msra.mxu0 %v1184_v15 }
 0x225   :  { %994 = vmatprep.subr.mxu0 %v1141_v13 }
 0x2e1   :  { %v142_v20 = vpop.f32.mrf.mxu0 }
 0x2e2   :  { %v143_v21 = vadd.f32 %v142_v20, %v69_v19 }
 0x2e3   :  { %v972_v22 = vpop.f32.mrf.mxu0 }
 0x2e4   :  { %v918_v23 = vmul.f32 -1.442695, %v143_v21 }
 0x2e6   :  { %1041 = vpow2.f32 %v918_v23 }
 0x2f3   :  { %v1042_v24 = vpop.eup %1041 }
 0x2f4   :  { %v149_v25 = vadd.f32 1.0, %v1042_v24 }
 0x2f6   :  { %1043 = vrcp.f32 %v149_v25 }
 0x303   :  { %v1044_v26 = vpop.eup %1043 }
 0x304   :  { %v152_v27 = vmul.f32 2.0, %v1044_v26  ;;  %v154_v31 = vmul.f32 %v1044_v26, %v61_v11 }
 0x306   :  { %v919_v28 = vadd.f32 -1.0, %v152_v27 }
 0x308   :  { %156 = vrot.lane.b32.xlu0 %v919_v28, %s1139_s0 }
 0x37a   :  { %v157_v29 = vpop.permute.xlu0 %156 }
 0x37b   :  { %v159_v30 = vmul.f32 %v1044_v26, %v157_v29 }
 0x37d   :  { %161 = vrot.lane.b32.xlu1 %v159_v30, %s1140_s23 }
 0x3ef   :  { %v162_v32 = vpop.permute.xlu1 %161 }
 0x3f0   :  { %v164_v33 = vadd.f32 %v162_v32, %v154_v31 }
 0x3f2   :  { %1045 = vtanh.f32 %v164_v33 }
 0x3ff   :  { %v1046_v34 = vpop.eup %1045 }
 0x400   :  { %167 = vrot.lane.b32.xlu0 %v1046_v34, %s1134_s12  ;;  %v478_v34 = vld [vmem:[#allocation2 + $0xa] sm:$0x3] }
 0x472   :  { %v168_v35 = vpop.permute.xlu0 %167 }
 0x473   :  { %v170_v36 = vmul.f32 %v1044_v26, %v168_v35 }
 0x475   :  { %174 = vrot.lane.b32.xlu1 %v170_v36, %s1143_s1 }
 0x4e7   :  { %v175_v37 = vpop.permute.xlu1 %174 }
 0x4e8   :  { %978 = vmatmul.mubr.msk.f32.vlgmr.msra.gmra.mxu1 %vm73_vm1, %v175_v37 }
 0x4e9   :  { %988 = vmatpush3.msra.mxu1 %v1171_v12  ;;  %991 = vmatprep.mubr.msk.f32.mxu1 %vm1142_vm0, %v1141_v13 }
 0x4ea   :  { %989 = vmatprep.subr.mxu1 %v1141_v13 }
 0x4eb   :  { %990 = vmatpush3.msra.mxu1 %v1184_v15 }
 0x4ec   :  { %1001 = vmatprep.subr.mxu1 %v1141_v13 }
 0x5a8   :  { %v244_v39 = vpop.f32.mrf.mxu1 }
 0x5a9   :  { %v245_v40 = vadd.f32 %v244_v39, %v172_v38 }
 0x5aa   :  { %v979_v41 = vpop.f32.mrf.mxu1 }
 0x5ab   :  { %v921_v42 = vmul.f32 -1.442695, %v245_v40 }
 0x5ad   :  { %1047 = vpow2.f32 %v921_v42 }
 0x5ba   :  { %v1048_v43 = vpop.eup %1047 }
 0x5bb   :  { %v251_v44 = vadd.f32 1.0, %v1048_v43 }
 0x5bd   :  { %1049 = vrcp.f32 %v251_v44 }
 0x5ca   :  { %v1050_v45 = vpop.eup %1049 }
 0x5cb   :  { %v254_v46 = vmul.f32 2.0, %v1050_v45  ;;  %v256_v50 = vmul.f32 %v1050_v45, %v164_v33 }
 0x5cd   :  { %v922_v47 = vadd.f32 -1.0, %v254_v46 }
 0x5cf   :  { %258 = vrot.lane.b32.xlu0 %v922_v47, %s1139_s0 }
 0x641   :  { %v259_v48 = vpop.permute.xlu0 %258 }
 0x642   :  { %v261_v49 = vmul.f32 %v1050_v45, %v259_v48 }
 0x644   :  { %263 = vrot.lane.b32.xlu1 %v261_v49, %s1140_s23 }
 0x6b6   :  { %v264_v51 = vpop.permute.xlu1 %263 }
 0x6b7   :  { %v266_v52 = vadd.f32 %v264_v51, %v256_v50 }
 0x6b9   :  { %1051 = vtanh.f32 %v266_v52 }
 0x6c6   :  { %v1052_v53 = vpop.eup %1051 }
 0x6c7   :  { %269 = vrot.lane.b32.xlu0 %v1052_v53, %s1134_s12  ;;  %v580_v53 = vld [vmem:[#allocation2 + $0xc] sm:$0x3] }
 0x739   :  { %v270_v54 = vpop.permute.xlu0 %269 }
 0x73a   :  { %v272_v55 = vmul.f32 %v1050_v45, %v270_v54 }
 0x73c   :  { %276 = vrot.lane.b32.xlu1 %v272_v55, %s1143_s1 }
 0x7ae   :  { %v277_v56 = vpop.permute.xlu1 %276 }
 0x7af   :  { %985 = vmatmul.mubr.msk.f32.vlgmr.msra.gmra.mxu0 %vm73_vm1, %v277_v56 }
 0x7b0   :  { %995 = vmatpush3.msra.mxu0 %v1171_v12  ;;  %998 = vmatprep.mubr.msk.f32.mxu0 %vm1142_vm0, %v1141_v13 }
 0x7b1   :  { %996 = vmatprep.subr.mxu0 %v1141_v13 }
 0x7b2   :  { %997 = vmatpush3.msra.mxu0 %v1184_v15 }
 0x7b3   :  { %1008 = vmatprep.subr.mxu0 %v1141_v13 }
 0x86f   :  { %v346_v58 = vpop.f32.mrf.mxu0 }
 0x870   :  { %v347_v59 = vadd.f32 %v346_v58, %v274_v57 }
 0x871   :  { %v986_v60 = vpop.f32.mrf.mxu0 }
 0x872   :  { %v924_v61 = vmul.f32 -1.442695, %v347_v59 }
 0x874   :  { %1053 = vpow2.f32 %v924_v61 }
 0x881   :  { %v1054_v62 = vpop.eup %1053 }
 0x882   :  { %v353_v63 = vadd.f32 1.0, %v1054_v62 }
 0x884   :  { %1055 = vrcp.f32 %v353_v63 }
 0x891   :  { %v1056_v0 = vpop.eup %1055 }
 0x892   :  { %v356_v1 = vmul.f32 2.0, %v1056_v0  ;;  %v358_v5 = vmul.f32 %v1056_v0, %v266_v52 }
 0x894   :  { %v925_v2 = vadd.f32 -1.0, %v356_v1 }
 0x896   :  { %360 = vrot.lane.b32.xlu0 %v925_v2, %s1139_s0 }
 0x908   :  { %v361_v3 = vpop.permute.xlu0 %360 }
 0x909   :  { %v363_v4 = vmul.f32 %v1056_v0, %v361_v3 }
 0x90b   :  { %365 = vrot.lane.b32.xlu1 %v363_v4, %s1140_s23 }
 0x97d   :  { %v366_v6 = vpop.permute.xlu1 %365 }
 0x97e   :  { %v368_v7 = vadd.f32 %v366_v6, %v358_v5  ;;  %v682_v5 = vld [vmem:[#allocation2 + $0xe] sm:$0x3] }
 0x980   :  { %1057 = vtanh.f32 %v368_v7 }
 0x98d   :  { %v1058_v8 = vpop.eup %1057 }
 0x98e   :  { %371 = vrot.lane.b32.xlu0 %v1058_v8, %s1134_s12 }
 0xa00   :  { %v372_v9 = vpop.permute.xlu0 %371 }
 0xa01   :  { %v374_v10 = vmul.f32 %v1056_v0, %v372_v9 }
 0xa03   :  { %378 = vrot.lane.b32.xlu1 %v374_v10, %s1143_s1 }
 0xa75   :  { %v379_v11 = vpop.permute.xlu1 %378 }
 0xa76   :  { %992 = vmatmul.mubr.msk.f32.vlgmr.msra.gmra.mxu1 %vm73_vm1, %v379_v11 }
 0xa77   :  { %1002 = vmatpush3.msra.mxu1 %v1171_v12  ;;  %1005 = vmatprep.mubr.msk.f32.mxu1 %vm1142_vm0, %v1141_v13 }
 0xa78   :  { %1003 = vmatprep.subr.mxu1 %v1141_v13 }
 0xa79   :  { %1004 = vmatpush3.msra.mxu1 %v1184_v15 }
 0xa7a   :  { %1015 = vmatprep.subr.mxu1 %v1141_v13 }
 0xb36   :  { %v448_v16 = vpop.f32.mrf.mxu1 }
 0xb37   :  { %v449_v17 = vadd.f32 %v448_v16, %v376_v14 }
 0xb38   :  { %v993_v18 = vpop.f32.mrf.mxu1 }
 0xb39   :  { %v927_v19 = vmul.f32 -1.442695, %v449_v17 }
 0xb3b   :  { %1059 = vpow2.f32 %v927_v19 }
 0xb48   :  { %v1060_v20 = vpop.eup %1059 }
 0xb49   :  { %v455_v21 = vadd.f32 1.0, %v1060_v20 }
 0xb4b   :  { %1061 = vrcp.f32 %v455_v21 }
 0xb58   :  { %v1062_v22 = vpop.eup %1061 }
 0xb59   :  { %v458_v23 = vmul.f32 2.0, %v1062_v22  ;;  %v460_v27 = vmul.f32 %v1062_v22, %v368_v7 }
 0xb5b   :  { %v928_v24 = vadd.f32 -1.0, %v458_v23 }
 0xb5d   :  { %462 = vrot.lane.b32.xlu0 %v928_v24, %s1139_s0 }
 0xbcf   :  { %v463_v25 = vpop.permute.xlu0 %462 }
 0xbd0   :  { %v465_v26 = vmul.f32 %v1062_v22, %v463_v25 }
 0xbd2   :  { %467 = vrot.lane.b32.xlu1 %v465_v26, %s1140_s23 }
 0xc44   :  { %v468_v28 = vpop.permute.xlu1 %467 }
 0xc45   :  { %v470_v29 = vadd.f32 %v468_v28, %v460_v27  ;;  %v784_v27 = vld [vmem:[#allocation2 + $0x10] sm:$0x3] }
 0xc47   :  { %1063 = vtanh.f32 %v470_v29 }
 0xc54   :  { %v1064_v30 = vpop.eup %1063 }
 0xc55   :  { %473 = vrot.lane.b32.xlu0 %v1064_v30, %s1134_s12 }
 0xcc7   :  { %v474_v31 = vpop.permute.xlu0 %473 }
 0xcc8   :  { %v476_v32 = vmul.f32 %v1062_v22, %v474_v31 }
 0xcca   :  { %480 = vrot.lane.b32.xlu1 %v476_v32, %s1143_s1 }
 0xd3c   :  { %v481_v33 = vpop.permute.xlu1 %480 }
 0xd3d   :  { %999 = vmatmul.mubr.msk.f32.vlgmr.msra.gmra.mxu0 %vm73_vm1, %v481_v33 }
 0xd3e   :  { %1009 = vmatpush3.msra.mxu0 %v1171_v12  ;;  %1012 = vmatprep.mubr.msk.f32.mxu0 %vm1142_vm0, %v1141_v13 }
 0xd3f   :  { %1010 = vmatprep.subr.mxu0 %v1141_v13 }
 0xd40   :  { %1011 = vmatpush3.msra.mxu0 %v1184_v15 }
 0xdfd   :  { %v550_v35 = vpop.f32.mrf.mxu0 }
 0xdfe   :  { %v551_v36 = vadd.f32 %v550_v35, %v478_v34 }
 0xdff   :  { %v1000_v37 = vpop.f32.mrf.mxu0 }
 0xe00   :  { %v930_v38 = vmul.f32 -1.442695, %v551_v36 }
 0xe02   :  { %1065 = vpow2.f32 %v930_v38 }
 0xe0f   :  { %v1066_v39 = vpop.eup %1065 }
 0xe10   :  { %v557_v40 = vadd.f32 1.0, %v1066_v39  ;;  %v941_v39 = vld [vmem:[#allocation4 + $0x10] ss:$0 sm:$0xff] }
 0xe12   :  { %1067 = vrcp.f32 %v557_v40 }
 0xe1f   :  { %v1068_v41 = vpop.eup %1067 }
 0xe20   :  { %v560_v42 = vmul.f32 2.0, %v1068_v41  ;;  %v562_v46 = vmul.f32 %v1068_v41, %v470_v29 }
 0xe22   :  { %v931_v43 = vadd.f32 -1.0, %v560_v42 }
 0xe24   :  { %564 = vrot.lane.b32.xlu0 %v931_v43, %s1139_s0 }
 0xe96   :  { %v565_v44 = vpop.permute.xlu0 %564 }
 0xe97   :  { %v567_v45 = vmul.f32 %v1068_v41, %v565_v44 }
 0xe99   :  { %569 = vrot.lane.b32.xlu1 %v567_v45, %s1140_s23 }
 0xf0b   :  { %v570_v47 = vpop.permute.xlu1 %569 }
 0xf0c   :  { %v572_v48 = vadd.f32 %v570_v47, %v562_v46 }
 0xf0e   :  { %1069 = vtanh.f32 %v572_v48 }
 0xf1b   :  { %v1070_v49 = vpop.eup %1069 }
 0xf1c   :  { %575 = vrot.lane.b32.xlu0 %v1070_v49, %s1134_s12 }
 0xf8e   :  { %v576_v50 = vpop.permute.xlu0 %575 }
 0xf8f   :  { %v578_v51 = vmul.f32 %v1068_v41, %v576_v50 }
 0xf91   :  { %582 = vrot.lane.b32.xlu1 %v578_v51, %s1143_s1 }
0x1003   :  { %v583_v52 = vpop.permute.xlu1 %582 }
0x1004   :  { %1006 = vmatmul.mubr.msk.f32.vlgmr.msra.gmra.mxu1 %vm73_vm1, %v583_v52 }
0x1005   :  { %1016 = vmatpush3.msra.mxu1 %v1171_v12  ;;  %1019 = vmatprep.mubr.msk.f32.mxu1 %vm1142_vm0, %v1141_v13 }
0x1006   :  { %1017 = vmatprep.subr.mxu1 %v1141_v13 }
0x1007   :  { %1018 = vmatpush3.msra.mxu1 %v1184_v15 }
0x10c4   :  { %v652_v54 = vpop.f32.mrf.mxu1 }
0x10c5   :  { %v653_v55 = vadd.f32 %v652_v54, %v580_v53 }
0x10c6   :  { %v1007_v56 = vpop.f32.mrf.mxu1 }
0x10c7   :  { %v933_v57 = vmul.f32 -1.442695, %v653_v55 }
0x10c9   :  { %1071 = vpow2.f32 %v933_v57 }
0x10d6   :  { %v1072_v58 = vpop.eup %1071 }
0x10d7   :  { %v659_v59 = vadd.f32 1.0, %v1072_v58 }
0x10d9   :  { %1073 = vrcp.f32 %v659_v59 }
0x10e6   :  { %v1074_v60 = vpop.eup %1073 }
0x10e7   :  { %v662_v61 = vmul.f32 2.0, %v1074_v60  ;;  %v664_v13 = vmul.f32 %v1074_v60, %v572_v48 }
0x10e9   :  { %v934_v62 = vadd.f32 -1.0, %v662_v61 }
0x10eb   :  { %666 = vrot.lane.b32.xlu0 %v934_v62, %s1139_s0 }
0x115d   :  { %v667_v12 = vpop.permute.xlu0 %666 }
0x115e   :  { %v669_v63 = vmul.f32 %v1074_v60, %v667_v12 }
0x1160   :  { %671 = vrot.lane.b32.xlu1 %v669_v63, %s1140_s23 }
0x11d2   :  { %v672_v15 = vpop.permute.xlu1 %671 }
0x11d3   :  { %v674_v0 = vadd.f32 %v672_v15, %v664_v13 }
0x11d5   :  { %1075 = vtanh.f32 %v674_v0 }
0x11e2   :  { %v1076_v1 = vpop.eup %1075 }
0x11e3   :  { %677 = vrot.lane.b32.xlu0 %v1076_v1, %s1134_s12 }
0x1255   :  { %v678_v2 = vpop.permute.xlu0 %677 }
0x1256   :  { %v680_v3 = vmul.f32 %v1074_v60, %v678_v2 }
0x1258   :  { %684 = vrot.lane.b32.xlu1 %v680_v3, %s1143_s1 }
0x12ca   :  { %v685_v4 = vpop.permute.xlu1 %684 }
0x12cb   :  { %1013 = vmatmul.mubr.msk.f32.vlgmr.msra.gmra.mxu0 %vm73_vm1, %v685_v4 }
0x138b   :  { %v754_v6 = vpop.f32.mrf.mxu0 }
0x138c   :  { %v755_v7 = vadd.f32 %v754_v6, %v682_v5 }
0x138d   :  { %v1014_v8 = vpop.f32.mrf.mxu0 }
0x138e   :  { %v936_v9 = vmul.f32 -1.442695, %v755_v7 }
0x1390   :  { %1077 = vpow2.f32 %v936_v9 }
0x139d   :  { %v1078_v10 = vpop.eup %1077 }
0x139e   :  { %v761_v11 = vadd.f32 1.0, %v1078_v10 }
0x13a0   :  { %1079 = vrcp.f32 %v761_v11 }
0x13ad   :  { %v1080_v14 = vpop.eup %1079 }
0x13ae   :  { %v764_v16 = vmul.f32 2.0, %v1080_v14  ;;  %v766_v20 = vmul.f32 %v1080_v14, %v674_v0 }
0x13b0   :  { %v937_v17 = vadd.f32 -1.0, %v764_v16 }
0x13b2   :  { %768 = vrot.lane.b32.xlu0 %v937_v17, %s1139_s0 }
0x1424   :  { %v769_v18 = vpop.permute.xlu0 %768 }
0x1425   :  { %v771_v19 = vmul.f32 %v1080_v14, %v769_v18 }
0x1427   :  { %773 = vrot.lane.b32.xlu1 %v771_v19, %s1140_s23 }
0x1499   :  { %v774_v21 = vpop.permute.xlu1 %773 }
0x149a   :  { %v776_v22 = vadd.f32 %v774_v21, %v766_v20 }
0x149c   :  { %1081 = vtanh.f32 %v776_v22 }
0x14a9   :  { %v1082_v23 = vpop.eup %1081 }
0x14aa   :  { %779 = vrot.lane.b32.xlu0 %v1082_v23, %s1134_s12 }
0x151c   :  { %v780_v24 = vpop.permute.xlu0 %779 }
0x151d   :  { %v782_v25 = vmul.f32 %v1080_v14, %v780_v24 }
0x151f   :  { %786 = vrot.lane.b32.xlu1 %v782_v25, %s1143_s1 }
0x1591   :  { %v787_v26 = vpop.permute.xlu1 %786 }
0x1592   :  { %1020 = vmatmul.mubr.msk.f32.vlgmr.msra.gmra.mxu1 %vm73_vm1, %v787_v26 }
0x1652   :  { %v856_v28 = vpop.f32.mrf.mxu1 }
0x1653   :  { %v857_v29 = vadd.f32 %v856_v28, %v784_v27 }
0x1654   :  { %v1021_v30 = vpop.f32.mrf.mxu1 }
0x1655   :  { %v939_v31 = vmul.f32 -1.442695, %v857_v29 }
0x1657   :  { %1083 = vpow2.f32 %v939_v31 }
0x1664   :  { %v1084_v32 = vpop.eup %1083 }
0x1665   :  { %v863_v33 = vadd.f32 1.0, %v1084_v32 }
0x1667   :  { %1085 = vrcp.f32 %v863_v33 }
0x1674   :  { %v1086_v34 = vpop.eup %1085 }
0x1675   :  { %v866_v35 = vmul.f32 2.0, %v1086_v34  ;;  %v868_v40 = vmul.f32 %v1086_v34, %v776_v22 }
0x1677   :  { %v940_v36 = vadd.f32 -1.0, %v866_v35 }
0x1679   :  { %870 = vrot.lane.b32.xlu0 %v940_v36, %s1139_s0 }
0x16eb   :  { %v871_v37 = vpop.permute.xlu0 %870 }
0x16ec   :  { %v873_v38 = vmul.f32 %v1086_v34, %v871_v37 }
0x16ee   :  { %875 = vrot.lane.b32.xlu1 %v873_v38, %s1140_s23 }
0x16f2   :  { %890 = vrot.lane.b32.xlu1 %v941_v39, %s1144_s24 }
0x1760   :  { %v876_v41 = vpop.permute.xlu1 %875 }
0x1761   :  { %v878_v42 = vadd.f32 %v876_v41, %v868_v40 }
0x1763   :  { %1087 = vtanh.f32 %v878_v42 }
0x1764   :  { %v891_v45 = vpop.permute.xlu1 %890 }
0x1770   :  { %v1088_v43 = vpop.eup %1087 }
0x1771   :  { %881 = vrot.lane.b32.xlu0 %v1088_v43, %s1134_s12 }
0x17e3   :  { %v882_v44 = vpop.permute.xlu0 %881 }
0x17e4   :  { %v884_v46 = vmul.f32 %v1086_v34, %v882_v44 }
0x17e6   :  { %v893_v47 = vmul.f32 %v891_v45, %v884_v46 }
0x17e8   :  { %895 = vrot.lane.b32.xlu0 %v893_v47, %s1143_s1 }
0x185a   :  { %v896_v48 = vpop.permute.xlu0 %895 }
0x185b   :  { %v899_v49 = vsel %vm898_vm2, %v896_v48, 0.0 }
0x185c   :  { %900 = vadd.xlane.f32.xlu1 %v899_v49 }
0x18e5   :  { %v901_v50 = vpop.xlane.xlu1 %900 }
0x18e6   :  { %v902_v51 = vadd.f32 %v941_v39, %v901_v50 }
0x18e8   :  { %904 = vrot.lane.b32.xlu0 %v902_v51, %s1145_s25 }
0x195a   :  { %v905_v52 = vpop.permute.xlu0 %904 }
0x195b   :  { %908 = vst.msk [vmem:[%s1270_s2] sm:$0x3] %vm907_vm3, %v905_v52 }
0x195c   :  { %913 = vsyncpa [#allocation3], 1 }
0x195d   :  { %914 = vsyncpa [#allocation5], 1 }

</bundles_post_ra>
